<compile_context>
chip_gen: v7x
topology: tpu7x:2x2x1
jax: 0.10.0
libtpu: 0.0.40
codegen_flags: <defaults>
</compile_context>

<pallas_src>
import functools

import jax
import jax.numpy as jnp
import numpy as np
from jax.experimental import pallas as pl
from jax.experimental.pallas import tpu as pltpu


def _tanh_gelu(x):
    # tanh-approximate GELU: 0.5*x*(1+tanh(sqrt(2/pi)*(x+0.044715*x^3))).
    # tanh runs on the EUP slot (free vs. the VALU); max abs deviation from the
    # exact erf GELU used by torch.nn.functional.gelu is ~3e-3.
    c0 = 0.7978845608028654  # sqrt(2/pi)
    c1 = 0.044715
    return 0.5 * x * (1.0 + jnp.tanh(c0 * (x + c1 * x * x * x)))


def _head_kernel(h_ref, ctx_ref, wd_ref, bd_ref, wc_ref, bc_ref, out_ref, *, eps):
    # h_ref: (1, tS, H) bf16 sequence tile; ctx_ref: (1, 1, H) bf16 CLS row.
    x = h_ref[0].astype(jnp.float32)                    # (tS, H)
    ctx = ctx_ref[0].astype(jnp.float32)                # (1, H)
    y = x + ctx                                         # broadcast over seq tile

    # LayerNorm statistics in f32 (biased variance, like torch.nn.LayerNorm).
    mu = jnp.mean(y, axis=-1, keepdims=True)            # (tS, 1)
    d = y - mu
    var = jnp.mean(d * d, axis=-1, keepdims=True)
    r = jax.lax.rsqrt(var + eps)                        # (tS, 1) per-row scale

    # dense: Linear(H, H) on the MXU (bf16 operands, f32 accumulate).
    # LN affine (gamma/beta) is pre-folded into wd/bd in the wrapper; the
    # per-row rsqrt is applied to the matmul OUTPUT, so the normalized (tS, H)
    # f32 tensor is never materialized:
    #   ((d*r)*gamma + beta) @ W^T + b == r * (d @ (gamma[:,None]*W^T)) + (beta@W^T + b)
    z = jnp.dot(d.astype(jnp.bfloat16), wd_ref[...],
                preferred_element_type=jnp.float32)      # (tS, H) f32
    z = r * z + bd_ref[...]
    z = _tanh_gelu(z)

    # classifier: Linear(H, 1) as a VPU multiply + XLU lane-reduce (an N=1
    # matmul would waste the MXU), then a tiny transpose so the store is a
    # lane-dense (1, tS) row (no masked partial stores).
    col = jnp.sum(z * wc_ref[...], axis=-1, keepdims=True)       # (tS, 1)
    row = jnp.transpose(col) + bc_ref[...]                       # (1, tS)
    out_ref[...] = row[None, :, :].astype(out_ref.dtype)         # (1, 1, tS)


def _vmem_plan():
    """Returns (working-set budget for tile picking, vmem_limit_bytes or None)."""
    try:
        phys = getattr(pltpu.get_tpu_info(), "vmem_capacity_bytes", None)
    except Exception:
        phys = None
    if phys is None or phys <= 64 * 1024 * 1024:
        # v7x (64 MiB physical, 32 MiB scoped default) or unknown: stay inside
        # the default scoped limit with headroom for compiler scratch.
        return 20 * 1024 * 1024, None
    # v5e / v6e (128 MiB physical): bigger tiles amortize the ~0.35us/step
    # grid overhead; raise the scoped limit explicitly.
    return 40 * 1024 * 1024, 96 * 1024 * 1024


def _working_set_bytes(t, H):
    # resident bf16 weights/biases + double-buffered bf16 input tile
    # + ~6 live f32 (t, H) temporaries (y, d, matmul result, GELU intermediates).
    return (H * H * 2 + 4 * H * 4) + 2 * t * H * 2 + 6 * t * H * 4


def _pick_seq_tile(S, H, budget):
    for c in (1024, 512, 256, 128):        # multiples of 128 -> lane-dense output
        if S % c == 0 and _working_set_bytes(c, H) <= budget:
            return c
    if _working_set_bytes(S, H) <= budget:
        return S                           # small / oddly-sized S: one step
    return None                            # caller pads S to a multiple of 128


@functools.partial(jax.jit, static_argnames=("eps",))
def _forward(hidden_states, ln_gamma, ln_beta, dense_w, dense_b,
             cls_w, cls_b, *, eps):
    B, S, H = hidden_states.shape
    budget, vmem_limit = _vmem_plan()

    tS = _pick_seq_tile(S, H, budget)
    S_pad = S
    if tS is None:                          # oversized odd S: pad, don't OOM v7x
        S_pad = pl.cdiv(S, 128) * 128
        tS = _pick_seq_tile(S_pad, H, budget) or 128
    n_s = S_pad // tS
    # TODO(synk): if B == 1 and n_s == 1 on v7x the second TensorCore idles; a
    # masked sub-128 split of S would be needed to use both cores in that case.

    # Inputs travel as bf16 (halves HBM traffic / input VMEM); the kernel
    # upcasts to f32 before the LayerNorm statistics.
    h = hidden_states.astype(jnp.bfloat16)
    ctx = h[:, 0:1, :]                                  # (B, 1, H) CLS context
    if S_pad != S:
        h = jnp.pad(h, ((0, 0), (0, S_pad - S), (0, 0)))

    # Fold LayerNorm affine into the dense layer. Runs inside this jit (a few
    # fused XLA ops per call); cache the folded params upstream if the head is
    # called repeatedly with fixed weights.
    f32 = jnp.float32
    wd_t = dense_w.astype(f32).T                                   # (H_in, H_out)
    wd_fold = (ln_gamma.astype(f32)[:, None] * wd_t).astype(jnp.bfloat16)
    bd_fold = (ln_beta.astype(f32) @ wd_t + dense_b.astype(f32)).reshape(1, H)
    wc2 = cls_w.reshape(1, H).astype(f32)
    bc2 = cls_b.reshape(1, 1).astype(f32)

    # Constant-index operands: one pipeline buffer is enough (saves H*H*2 B VMEM).
    def _const_spec(shape):
        return pl.BlockSpec(shape, lambda b, s: (0,) * len(shape),
                            pipeline_mode=pl.Buffered(1))

    cost = pl.CostEstimate(
        flops=2 * B * S_pad * H * H + 2 * B * S_pad * H,
        transcendentals=B * S_pad * H,                    # tanh in the GELU
        bytes_accessed=(B * S_pad * H * 2 + B * H * 2     # hidden + ctx (bf16)
                        + H * H * 2 + 3 * H * 4 + 4       # weights / biases
                        + B * S_pad * 4))                 # logits (f32)

    cp = dict(dimension_semantics=("parallel", "parallel"))
    if vmem_limit is not None:
        cp["vmem_limit_bytes"] = vmem_limit

    out = pl.pallas_call(
        functools.partial(_head_kernel, eps=eps),
        out_shape=jax.ShapeDtypeStruct((B, 1, S_pad), jnp.float32),
        grid_spec=pltpu.PrefetchScalarGridSpec(
            num_scalar_prefetch=0,
            grid=(B, n_s),
            in_specs=[
                pl.BlockSpec((1, tS, H), lambda b, s: (b, s, 0)),  # hidden tile
                pl.BlockSpec((1, 1, H), lambda b, s: (b, 0, 0)),   # CLS row
                _const_spec((H, H)),                               # folded dense W (bf16)
                _const_spec((1, H)),                               # folded dense bias
                _const_spec((1, H)),                               # classifier W
                _const_spec((1, 1)),                               # classifier bias
            ],
            out_specs=pl.BlockSpec((1, 1, tS), lambda b, s: (b, 0, s)),  # lane-dense
        ),
        compiler_params=pltpu.CompilerParams(**cp),
        cost_estimate=cost,
    )(h, ctx, wd_fold, bd_fold, wc2, bc2)
    return out[:, 0, :S]                                  # (B, S) float32


def lm_mask_prediction_head(hidden_states, ln_gamma, ln_beta,
                            dense_w, dense_b, cls_w, cls_b, *, eps=1e-7):
    """Returns logits of shape (B, S) float32, matching LMMaskPredictionHead.forward."""
    return _forward(hidden_states, ln_gamma, ln_beta, dense_w, dense_b,
                    cls_w, cls_b, eps=eps)


def _reference(hidden_states, ln_gamma, ln_beta, dense_w, dense_b, cls_w, cls_b, eps):
    hs = hidden_states.astype(jnp.float32)
    ctx = hs[:, 0:1, :]
    y = ctx + hs
    mu = jnp.mean(y, -1, keepdims=True)
    var = jnp.mean((y - mu) ** 2, -1, keepdims=True)
    yn = (y - mu) / jnp.sqrt(var + eps) * ln_gamma + ln_beta
    z = yn @ dense_w.T + dense_b
    z = jax.nn.gelu(z, approximate=False)       # exact erf GELU (torch default)
    return (z @ cls_w.T + cls_b)[..., 0]


if __name__ == "__main__":
    B, S, H = 2, 8, 32
    eps = 1e-7   # config.layer_norm_eps (DeBERTa default)

    key = jax.random.PRNGKey(0)
    k_h, k_g, k_b, k_wd, k_bd, k_wc, k_bc, k_ids = jax.random.split(key, 8)

    # The head would normally receive bf16 activations from the encoder; feed
    # bf16 so the kernel DMAs half the bytes (it upcasts internally).
    hidden_states = jax.random.normal(k_h, (B, S, H), jnp.float32).astype(jnp.bfloat16)

    # Module parameters (deterministic synthetic init, shapes from __init__):
    ln_gamma = 1.0 + 0.1 * jax.random.normal(k_g, (H,), jnp.float32)
    ln_beta = 0.1 * jax.random.normal(k_b, (H,), jnp.float32)
    dense_w = 0.05 * jax.random.normal(k_wd, (H, H), jnp.float32)   # nn.Linear(H, H)
    dense_b = 0.05 * jax.random.normal(k_bd, (H,), jnp.float32)
    cls_w = 0.05 * jax.random.normal(k_wc, (1, H), jnp.float32)     # nn.Linear(H, 1)
    cls_b = 0.05 * jax.random.normal(k_bc, (1,), jnp.float32)

    # input_ids / input_mask only feed the lm_labels loss branch (not returned).
    input_ids = jax.random.randint(k_ids, (B, S), 0, 100)
    input_mask = jnp.ones((B, S), jnp.int32)
    # TODO(synk): the lm_labels loss branch (variable-length nonzero gather +
    # BCEWithLogitsLoss) is data-dependent and does not affect the returned
    # logits; it is not implemented in the kernel.

    logits = lm_mask_prediction_head(hidden_states, ln_gamma, ln_beta,
                                     dense_w, dense_b, cls_w, cls_b, eps=eps)
    logits = jax.block_until_ready(logits)
    assert logits.shape == (B, S)

    ref = _reference(hidden_states, ln_gamma, ln_beta, dense_w, dense_b,
                     cls_w, cls_b, eps)
    # bf16 MXU operands + tanh-approximate GELU vs. the pure-f32 exact-erf
    # reference -> compare at bf16-appropriate tolerance.
    np.testing.assert_allclose(np.asarray(logits), np.asarray(ref),
                               rtol=1e-2, atol=1e-2)
    print("KERNEL_OK")
</pallas_src>

<mosaic_0001>
module attributes {stable_mosaic.version = 11 : i64} {
  func.func @_head_kernel(%arg0: i32, %arg1: i32, %arg2: memref<1x8x32xbf16, #tpu.memory_space<vmem>>, %arg3: memref<1x1x32xbf16, #tpu.memory_space<vmem>>, %arg4: memref<32x32xbf16, #tpu.memory_space<vmem>>, %arg5: memref<1x32xf32, #tpu.memory_space<vmem>>, %arg6: memref<1x32xf32, #tpu.memory_space<vmem>>, %arg7: memref<1x1xf32, #tpu.memory_space<vmem>>, %arg8: memref<1x1x8xf32, #tpu.memory_space<vmem>>) attributes {dimension_semantics = [#tpu.dimension_semantics<parallel>, #tpu.dimension_semantics<parallel>], iteration_bounds = array<i64: 2, 1>, scalar_prefetch = 0 : i64, scratch_operands = 0 : i64, tpu.core_type = #tpu.core_type<tc>, window_params = [{transform_indices = @transform_0, window_bounds = array<i64: 1, 8, 32>}, {transform_indices = @transform_1, window_bounds = array<i64: 1, 1, 32>}, {pipeline_mode = #tpu.pipeline_mode<synchronous>, transform_indices = @transform_2, window_bounds = array<i64: 32, 32>}, {pipeline_mode = #tpu.pipeline_mode<synchronous>, transform_indices = @transform_3, window_bounds = array<i64: 1, 32>}, {pipeline_mode = #tpu.pipeline_mode<synchronous>, transform_indices = @transform_4, window_bounds = array<i64: 1, 32>}, {pipeline_mode = #tpu.pipeline_mode<synchronous>, transform_indices = @transform_5, window_bounds = array<i64: 1, 1>}, {transform_indices = @transform_6, window_bounds = array<i64: 1, 1, 8>}]} {
    %c0 = arith.constant 0 : index
    %c0_0 = arith.constant 0 : index
    %c0_1 = arith.constant 0 : index
    %0 = vector.load %arg2[%c0, %c0_0, %c0_1] : memref<1x8x32xbf16, #tpu.memory_space<vmem>>, vector<1x8x32xbf16>
    %1 = vector.shape_cast %0 : vector<1x8x32xbf16> to vector<8x32xbf16>
    %2 = arith.extf %1 : vector<8x32xbf16> to vector<8x32xf32>
    %c0_2 = arith.constant 0 : index
    %c0_3 = arith.constant 0 : index
    %c0_4 = arith.constant 0 : index
    %3 = vector.load %arg3[%c0_2, %c0_3, %c0_4] : memref<1x1x32xbf16, #tpu.memory_space<vmem>>, vector<1x1x32xbf16>
    %4 = vector.shape_cast %3 : vector<1x1x32xbf16> to vector<1x32xbf16>
    %5 = arith.extf %4 : vector<1x32xbf16> to vector<1x32xf32>
    %6 = vector.broadcast %5 : vector<1x32xf32> to vector<8x32xf32>
    %7 = arith.addf %2, %6 : vector<8x32xf32>
    %cst = arith.constant dense<0.000000e+00> : vector<8xf32>
    %8 = vector.multi_reduction <add>, %7, %cst [1] : vector<8x32xf32> to vector<8xf32>
    %9 = vector.shape_cast %8 : vector<8xf32> to vector<8x1xf32>
    %cst_5 = arith.constant 3.200000e+01 : f32
    %10 = vector.broadcast %cst_5 : f32 to vector<8x1xf32>
    %11 = arith.divf %9, %10 : vector<8x1xf32>
    %12 = vector.broadcast %11 : vector<8x1xf32> to vector<8x32xf32>
    %13 = arith.subf %7, %12 : vector<8x32xf32>
    %14 = arith.mulf %13, %13 : vector<8x32xf32>
    %cst_6 = arith.constant dense<0.000000e+00> : vector<8xf32>
    %15 = vector.multi_reduction <add>, %14, %cst_6 [1] : vector<8x32xf32> to vector<8xf32>
    %16 = vector.shape_cast %15 : vector<8xf32> to vector<8x1xf32>
    %cst_7 = arith.constant 3.200000e+01 : f32
    %17 = vector.broadcast %cst_7 : f32 to vector<8x1xf32>
    %18 = arith.divf %16, %17 : vector<8x1xf32>
    %cst_8 = arith.constant 1.000000e-07 : f32
    %19 = vector.broadcast %cst_8 : f32 to vector<8x1xf32>
    %20 = arith.addf %18, %19 : vector<8x1xf32>
    %21 = math.rsqrt %20 : vector<8x1xf32>
    %22 = arith.truncf %13 : vector<8x32xf32> to vector<8x32xbf16>
    %c0_9 = arith.constant 0 : index
    %c0_10 = arith.constant 0 : index
    %23 = vector.load %arg4[%c0_9, %c0_10] : memref<32x32xbf16, #tpu.memory_space<vmem>>, vector<32x32xbf16>
    %cst_11 = arith.constant dense<0.000000e+00> : vector<8x32xf32>
    %24 = tpu.matmul %22, %23, %cst_11 {dimension_numbers = #tpu.dot_dimension_numbers<[1], [0], [0], [1], [0, 0, 1, 1], [], []>} : vector<8x32xbf16>, vector<32x32xbf16>, vector<8x32xf32> -> vector<8x32xf32>
    %25 = vector.broadcast %21 : vector<8x1xf32> to vector<8x32xf32>
    %26 = arith.mulf %25, %24 : vector<8x32xf32>
    %c0_12 = arith.constant 0 : index
    %c0_13 = arith.constant 0 : index
    %27 = vector.load %arg5[%c0_12, %c0_13] : memref<1x32xf32, #tpu.memory_space<vmem>>, vector<1x32xf32>
    %28 = vector.broadcast %27 : vector<1x32xf32> to vector<8x32xf32>
    %29 = arith.addf %26, %28 : vector<8x32xf32>
    %cst_14 = arith.constant 5.000000e-01 : f32
    %30 = vector.broadcast %cst_14 : f32 to vector<8x32xf32>
    %31 = arith.mulf %30, %29 : vector<8x32xf32>
    %cst_15 = arith.constant 4.471500e-02 : f32
    %32 = vector.broadcast %cst_15 : f32 to vector<8x32xf32>
    %33 = arith.mulf %32, %29 : vector<8x32xf32>
    %34 = arith.mulf %33, %29 : vector<8x32xf32>
    %35 = arith.mulf %34, %29 : vector<8x32xf32>
    %36 = arith.addf %29, %35 : vector<8x32xf32>
    %cst_16 = arith.constant 0.797884583 : f32
    %37 = vector.broadcast %cst_16 : f32 to vector<8x32xf32>
    %38 = arith.mulf %37, %36 : vector<8x32xf32>
    %39 = math.tanh %38 : vector<8x32xf32>
    %cst_17 = arith.constant 1.000000e+00 : f32
    %40 = vector.broadcast %cst_17 : f32 to vector<8x32xf32>
    %41 = arith.addf %40, %39 : vector<8x32xf32>
    %42 = arith.mulf %31, %41 : vector<8x32xf32>
    %c0_18 = arith.constant 0 : index
    %c0_19 = arith.constant 0 : index
    %43 = vector.load %arg6[%c0_18, %c0_19] : memref<1x32xf32, #tpu.memory_space<vmem>>, vector<1x32xf32>
    %44 = vector.broadcast %43 : vector<1x32xf32> to vector<8x32xf32>
    %45 = arith.mulf %42, %44 : vector<8x32xf32>
    %cst_20 = arith.constant dense<0.000000e+00> : vector<8xf32>
    %46 = vector.multi_reduction <add>, %45, %cst_20 [1] : vector<8x32xf32> to vector<8xf32>
    %47 = vector.shape_cast %46 : vector<8xf32> to vector<8x1xf32>
    %48 = tpu.transpose %47, [1, 0] : vector<8x1xf32> -> vector<1x8xf32>
    %c0_21 = arith.constant 0 : index
    %c0_22 = arith.constant 0 : index
    %49 = vector.load %arg7[%c0_21, %c0_22] : memref<1x1xf32, #tpu.memory_space<vmem>>, vector<1x1xf32>
    %50 = vector.broadcast %49 : vector<1x1xf32> to vector<1x8xf32>
    %51 = arith.addf %48, %50 : vector<1x8xf32>
    %52 = vector.shape_cast %51 : vector<1x8xf32> to vector<1x1x8xf32>
    %c0_23 = arith.constant 0 : index
    %c0_24 = arith.constant 0 : index
    %c0_25 = arith.constant 0 : index
    %53 = vector.load %arg8[%c0_23, %c0_24, %c0_25] : memref<1x1x8xf32, #tpu.memory_space<vmem>>, vector<1x1x8xf32>
    tpu.vector_store %arg8[%c0_23, %c0_24, %c0_25], %52 {strides = array<i32>} : memref<1x1x8xf32, #tpu.memory_space<vmem>>, vector<1x1x8xf32>,
    return
  }
  func.func @transform_0(%arg0: i32, %arg1: i32) -> (i32, i32, i32) {
    %c0_i32 = arith.constant 0 : i32
    %c0_i32_0 = arith.constant 0 : i32
    return %arg0, %arg1, %c0_i32 : i32, i32, i32
  }
  func.func @transform_1(%arg0: i32, %arg1: i32) -> (i32, i32, i32) {
    %c0_i32 = arith.constant 0 : i32
    %c0_i32_0 = arith.constant 0 : i32
    %c0_i32_1 = arith.constant 0 : i32
    return %arg0, %c0_i32, %c0_i32_0 : i32, i32, i32
  }
  func.func @transform_2(%arg0: i32, %arg1: i32) -> (i32, i32) {
    %c0_i32 = arith.constant 0 : i32
    %c0_i32_0 = arith.constant 0 : i32
    %c0_i32_1 = arith.constant 0 : i32
    return %c0_i32, %c0_i32_0 : i32, i32
  }
  func.func @transform_3(%arg0: i32, %arg1: i32) -> (i32, i32) {
    %c0_i32 = arith.constant 0 : i32
    %c0_i32_0 = arith.constant 0 : i32
    %c0_i32_1 = arith.constant 0 : i32
    return %c0_i32, %c0_i32_0 : i32, i32
  }
  func.func @transform_4(%arg0: i32, %arg1: i32) -> (i32, i32) {
    %c0_i32 = arith.constant 0 : i32
    %c0_i32_0 = arith.constant 0 : i32
    %c0_i32_1 = arith.constant 0 : i32
    return %c0_i32, %c0_i32_0 : i32, i32
  }
  func.func @transform_5(%arg0: i32, %arg1: i32) -> (i32, i32) {
    %c0_i32 = arith.constant 0 : i32
    %c0_i32_0 = arith.constant 0 : i32
    %c0_i32_1 = arith.constant 0 : i32
    return %c0_i32, %c0_i32_0 : i32, i32
  }
  func.func @transform_6(%arg0: i32, %arg1: i32) -> (i32, i32, i32) {
    %c0_i32 = arith.constant 0 : i32
    %c0_i32_0 = arith.constant 0 : i32
    return %arg0, %c0_i32, %arg1 : i32, i32, i32
  }
}

</mosaic_0001>

<bundles_post_ra>
// kernel: _forward.1
= control target key start
LH: loop header
LB: loop body
LE: loop exit
PB: predicated region body
PF: predicated region fallthrough
CT: control target
= control target key end

     0   :  { %s882_s0 = inlined_call_operand.vmem [shape: bf16[2,8,32], index: 0, kind: input, shape index: {}]   ;;  %s883_s1 = inlined_call_operand.vmem [shape: bf16[2,1,32], index: 1, kind: input, shape index: {}]   ;;  %s884_s2 = inlined_call_operand.vmem [shape: bf16[32,32], index: 2, kind: input, shape index: {}]   ;;  %s885_s3 = inlined_call_operand.vmem [shape: f32[1,32], index: 3, kind: input, shape index: {}]   ;;  %s886_s4 = inlined_call_operand.vmem [shape: f32[1,32], index: 4, kind: input, shape index: {}]   ;;  %s887_s5 = inlined_call_operand.<no memory space> [shape: f32[1,1], index: 5, kind: input, shape index: {}]   ;;  %s888_s6 = inlined_call_operand.hbm [shape: f32[2,1,8], index: 6, kind: output, shape index: {}]  }
   0x1   :  { %v11_v0 = vstv %s887_s5 }
   0x2   :  { %12 = vst [vmem:[#allocation2] sm:$0x1] %v11_v0 }
   0x3   :  { %13 = vsyncpa [#allocation4], 0 }
   0x4   :  { %15 = vsyncpa [#allocation4 + $0x1], 0  ;;  %s748_s23 = smov 0   ;;  %s750_s24 = smov 0  }
   0x5   :  { %s752_s25 = smov 0   ;;  %s754_s26 = smov 0  }
   0x6   :  { %s756_s27 = smov 0   ;;  %s758_s28 = smov 0  }
   0x7 LB: > { %s535_s5 = sadd.s32 4294967295, %s704_s28   ;;  %s536_s29 = sadd.s32 4294967294, %s704_s28   ;;  %s704_s28 = sphi %s758_s28, %s21_s28   ;;  %s700_s27 = sphi %s756_s27, %s895_s27   ;;  %s696_s26 = sphi %s754_s26, %s894_s26   ;;  %s692_s25 = sphi %s752_s25, %s893_s25   ;;  %s688_s24 = sphi %s750_s24, %s892_s24   ;;  %s684_s23 = sphi %s748_s23, %s891_s23  }
   0x8   : > { %s33_s30 = sadd.s32 1, %s700_s27  ;;  %s180_s7 = sadd.s32 1, %s692_s25 }
   0x9   : > { %p35_p0 = scmp.ge.s32.totalorder %s33_s30, 2  ;;  %p190_p1 = scmp.ne.s32.totalorder %s692_s25, %s688_s24 }
   0xa   : > { %p191_p2 = scmp.eq.s32.totalorder %s535_s5, 1  ;;  %p196_p3 = scmp.ne.s32.totalorder %s688_s24, %s684_s23 }
   0xb   : > { %s897_s30 = smov (%p35_p0, %s33_s30), 0  ;;  %p197_p5 = scmp.eq.s32.totalorder %s536_s29, 1 }
   0xc   : > { %p788_p4 = por %p191_p2, %p190_p1  ;;  %s175_s9 = ssub.s32 %s700_s27, %s897_s30 }
   0xd   : > { %p539_p6 = scmp.ge.s32.totalorder %s704_s28, 1  ;;  %p178_p7 = scmp.eq.s32.totalorder %s175_s9, 0 }
   0xe   : > { %p795_p8 = por %p197_p5, %p196_p3  ;;  %p243_p9 = scmp.lt.s32.totalorder %s704_s28, 3 }
   0xf   : > { %s801_s11 = scalar_select %p178_p7, %s692_s25, %s180_s7  }
  0x10   : > { %p244_p10 = pnand %p539_p6, %p243_p9 }
  0x11   : > { %p277_p11 = scmp.lt.s32.totalorder (!%p244_p10), %s696_s26, 1  ;;  %v292_v1 = vlaneseq (!%p244_p10)  ;;  %v620_v2 = vld [vmem:[%s884_s2] sm:$0xff] (!%p244_p10)   ;;  %v706_v3 = vmov (!%p244_p10), 0.0   ;;  %vm297_vm0 = vcmask (!%p244_p10), 261120   ;;  %v621_v13 = vld [vmem:[%s884_s2 + $0x8] sm:$0xff] (!%p244_p10)   ;;  %vm707_vm1 = vmmov (!%p244_p10), 0  }
  0x12   : > { %247 = sbr.rel (%p244_p10) target bundleno = 715 (0x2cb), region = 44  ;;  %552 = vmatprep.subr.bf16.mxu0 (!%p244_p10), %v706_v3  ;;  %556 = vmatprep.mubr.msk.bf16.mxu0 (!%p244_p10), %vm707_vm1, %v706_v3  ;;  %v708_v20 = vmov (!%p244_p10), 0   ;;  %v544_v26 = vld [vmem:[%s885_s3] ss:$0 sm:$0xff] (!%p244_p10)  ;;  %s275_s13 = sand.u32 (!%p244_p10), 1, %s688_s24   ;;  %vm443_vm2 = vcmask (!%p244_p10), 57344  }
  0x13   : > { %v808_v4 = vshrl.u32 (!%p244_p10), %v292_v1, 7  ;;  %553 = vmatpush3.bf16.msra.mxu0 (!%p244_p10), %v620_v2  ;;  %618 = vset.pattern.permute.xlu1 (!%p244_p10), %v708_v20  ;;  %v545_v40 = vld [vmem:[%s886_s4] ss:$0 sm:$0xff] (!%p244_p10)  ;;  %s446_s20 = scalar_lea.sflag (!%p244_p10), [#allocation4], %s275_s13 }
  0x14   : > { %554 = vmatprep.subr.bf16.mxu0 (!%p244_p10), %v706_v3  ;;  %v432_v44 = vld [vmem:[#allocation2] sm:$0x1] (!%p244_p10) }
  0x15   : > { %v294_v5 = vsub.s32 (!%p244_p10), 0, %v808_v4 }
  0x17   : > { %555 = vmatpush3.bf16.msra.mxu0 (!%p244_p10), %v621_v13 }
  0x19   : > { %s278_s14 = scalar_select %p277_p11, %s696_s26, 1 }
  0x1b   : > { %s540_s15 = sshll.u32 %s278_s14, 2  ;;  %s286_s18 = scalar_lea.vmem %s883_s1, %s278_s14 }
  0x1c   : > { %s283_s21 = scalar_lea.vmem %s882_s0, %s540_s15  ;;  %v290_v6 = vld [vmem:[%s286_s18] sm:$0x1]  ;;  %s546_s14 = sshll.u32 %s696_s26, 4 }
  0x1d   : > { %v288_v7 = vld [vmem:[%s283_s21] sm:$0xf]  ;;  %v291_v8 = vunpack.c.l.bf16 %v290_v6  ;;  %s276_s15 = scalar_lea.vmem [#allocation3], %s275_s13  ;;  %s835_s19 = scalar_lea.hbm %s888_s6, %s546_s14 }
  0x1e   : > { %v289_v9 = vunpack.c.l.bf16 %v288_v7  ;;  %s459_s16 = sshll.u32 %s276_s15, 4  ;;  %s709_s26 = smov [#allocation3]   ;;  %s837_s16 = int_to_ptr.vmem [resolvable:$true] %s459_s16 }
  0x1f   : > { %v295_v10 = vrot.slane %v291_v8, %v294_v5  ;;  %s626_s21 = scalar_lea.vmem %s837_s16, 16  ;;  %s630_s22 = sshll.u32 %s709_s26, 4  ;;  %s631_s22 = int_to_ptr.vmem [resolvable:$false] %s630_s22 }
  0x20   : > { %p627_p12 = scmp.ne.s32.totalorder %s837_s16, %s626_s21  ;;  %s632_s5 = scalar_lea.vmem %s631_s22, 32 }
  0x21   : > { %v296_v11 = vadd.f32 %v295_v10, %v289_v9  ;;  %p633_p1 = scmp.lt.s32.totalorder %s837_s16, %s631_s22  ;;  %p634_p2 = scmp.lt.s32.totalorder %s632_s5, %s626_s21 }
  0x22   : > { %p628_p13 = pnand %p627_p12, %p788_p4 }
  0x23   : > { %v298_v12 = vsel %vm297_vm0, %v296_v11, 0.0  ;;  %p635_p3 = por %p634_p2, %p633_p1 }
  0x24   : > { %299 = vadd.xlane.f32.xlu0 %v298_v12  ;;  %p629_p0 = pneg %p628_p13 }
  0x26   : > { %p636_p5 = pnand %p635_p3, %p629_p0 }
  0xb1   : > { %v300_v14 = vpop.xlane.xlu0 %299 }
  0xb2   : > { %v302_v15 = vmul.f32 0.03125, %v300_v14 }
  0xb4   : > { %v303_v16 = vsub.f32 %v296_v11, %v302_v15 }
  0xb6   : > { %v311_v17 = vpack.c.bf16 %v303_v16, %v303_v16  ;;  %v304_v18 = vmul.f32 %v303_v16, %v303_v16 }
  0xb8   : > { %557 = vmatmul.mubr.msk.bf16.vlgmr.msra.gmra.mrb[0].mxu0 %vm297_vm0, %v311_v17  ;;  %v305_v19 = vsel %vm297_vm0, %v304_v18, 0.0 }
  0xb9   : > { %306 = vadd.xlane.f32.xlu0 %v305_v19 }
 0x146   : > { %v307_v21 = vpop.xlane.xlu0 %306 }
 0x147   : > { %v308_v22 = vmul.f32 0.03125, %v307_v21 }
 0x149   : > { %v309_v23 = vadd.f32 1e-07, %v308_v22 }
 0x14b   : > { %622 = vrsqrt.f32 %v309_v23 }
 0x155   : > { %v623_v24 = vpop.eup %622 }
 0x18b   : > { %v365_v25 = vpop.f32.mrb[0].mxu0 }
 0x18c   : > { %v371_v27 = vmul.f32 %v623_v24, %v365_v25  ;;  %v558_v28 = vpop.f32.mrb[1].mxu0 }
 0x18d   : > { %v368_v29 = vpop.f32.mrb[2].mxu0 }
 0x18e   : > { %v379_v30 = vadd.f32 %v544_v26, %v371_v27  ;;  %v559_v31 = vpop.f32.mrb[3].mxu0 }
 0x190   : > { %v381_v32 = vmul.f32 0.044715, %v379_v30  ;;  %v380_v38 = vmul.f32 0.5, %v379_v30 }
 0x192   : > { %v382_v33 = vmul.f32 %v381_v32, %v379_v30 }
 0x194   : > { %v383_v34 = vmul.f32 %v382_v33, %v379_v30 }
 0x196   : > { %v384_v35 = vadd.f32 %v383_v34, %v379_v30 }
 0x198   : > { %v385_v36 = vmul.f32 0.7978846, %v384_v35 }
 0x19a   : > { %624 = vtanh.f32 %v385_v36 }
 0x1a4   : > { %v625_v37 = vpop.eup %624 }
 0x1a5   : > { %v387_v39 = vadd.f32 1.0, %v625_v37 }
 0x1a7   : > { %v388_v41 = vmul.f32 %v387_v39, %v380_v38 }
 0x1a9   : > { %v396_v42 = vmul.f32 %v545_v40, %v388_v41 }
 0x1ab   : > { %v397_v43 = vsel %vm297_vm0, %v396_v42, 0.0 }
 0x1ac   : > { %398 = vadd.xlane.f32.xlu1 %v397_v43 }
 0x1bd   : > { %435 = vperm.xlu1 %618, %v432_v44  }
 0x239   : > { %v399_v45 = vpop.xlane.xlu1 %398 }
 0x23a   : > { %400 = vxpose.xlu0.b32.start.end [1/1] (short) (narrow) %v399_v45, 8 }
 0x23d   : > { %v436_v46 = vpop.permute.xlu1 %435 }
 0x23e   : > { %v441_v47 = vrot.slane %v436_v46, %v294_v5 }
 0x263   : > { %619 = vset.pattern.permute.xlu0 %v708_v20 }
 0x2ba   : > { %v416_v48 = vpop.trf.xlu0 }
 0x2bb   : > { %v442_v49 = vadd.f32 %v441_v47, %v416_v48 }
 0x2bd   : > { %444 = vst.msk [vmem:[%s276_s15] sm:$0x1] %vm443_vm2, %v442_v49 }
 0x2be   : > { %639 = shalt.err (!%p636_p5)
}
 0x2bf   : > { %s640_s29 = scalar_lea.hbm %s835_s19, 16  ;;  %s644_s12 = scalar_lea.hbm %s888_s6, 32 }
 0x2c0   : > { %p641_p6 = scmp.ne.s32.totalorder %s835_s19, %s640_s29  ;;  %p645_p10 = scmp.lt.u32.totalorder %s835_s19, %s888_s6 }
 0x2c1   : > { %p646_p11 = scmp.lt.u32.totalorder %s644_s12, %s640_s29  ;;  %p648_p13 = scmp.lt.u32.totalorder %s640_s29, %s835_s19 }
 0x2c2   : > { %p642_p7 = pnand %p641_p6, %p788_p4 }
 0x2c3   : > { %p647_p12 = por %p646_p11, %p645_p10 }
 0x2c4   : > { %p643_p9 = pneg %p642_p7 }
 0x2c5   : > { %p649_p0 = por %p648_p13, %p647_p12 }
 0x2c7   : > { %p650_p1 = pnand %p649_p0, %p643_p9 }
 0x2c9   : > { %653 = shalt.err (!%p650_p1)
}
 0x2ca   : > { %560 = dma.vmem_to_hbm [thread:$0]  (%p788_p4), %s837_s16, 16, %s835_s19, %s446_s20  }
 0x2cb PF: > { %p566_p2 = scmp.ge.s32.totalorder %s704_s28, 2  ;;  %s471_s15 = sand.u32 1, %s684_s23  }
 0x2cc   : > { %s472_s17 = scalar_lea.sflag [#allocation4], %s471_s15 }
 0x2cd   : > { %p563_p3 = pnand %p566_p2, %p795_p8 }
 0x2cf   : > { %679 = dma.done.wait (!%p563_p3), %s472_s17, 16  }
 0x2d0   : > { %681 = vsyncadd (!%p563_p3), %s472_s17, 4294967280  ;;  %s21_s28 = sadd.s32 1, %s704_s28   ;;  %s891_s23 = smov %s688_s24 }
 0x2d1   : > { %p18_p5 = scmp.ge.s32.totalorder %s21_s28, 4   ;;  %s892_s24 = smov %s692_s25 }
 0x2d2   : > { %s893_s25 = smov %s801_s11  ;;  %s894_s26 = smov %s700_s27 }
 0x2d3   : > { %s895_s27 = smov %s897_s30  ;;  %20 = sbr.rel (!%p18_p5) target bundleno = 7 (0x7), region = 82 }
 0x2da   :  { %476 = vsyncpa [#allocation4], 1 }
 0x2db   :  { %478 = vsyncpa [#allocation4 + $0x1], 1 }

</bundles_post_ra>
